<compile_context>
chip_gen: v6e
topology: v6e:2x2x1
jax: 0.10.0
libtpu: 0.0.40
codegen_flags: <defaults>
</compile_context>

<pallas_src>
import functools

import jax
import jax.numpy as jnp
from jax.experimental import pallas as pl
from jax.experimental.pallas import tpu as pltpu

LANE = 128


def _round_up(n, m):
    return ((n + m - 1) // m) * m


def _vae_kernel(x_ref, eps_ref,
                w1_ref, b1_ref,
                w2_ref, b2_ref,      # fused, lane-padded (mu | logvar) head
                w3_ref, b3_ref,
                w4_ref, b4_ref,      # output dim padded to a lane multiple
                out_ref, *, opad):
    x = x_ref[...]                   # (2B, L)   fp32
    eps = eps_ref[...]               # (2B, opad) fp32, zero-padded

    # ---- encoder: fc1 -> ReLU (dropout = identity in eval mode) ----
    h1 = jnp.dot(x.astype(jnp.bfloat16), w1_ref[...],
                 preferred_element_type=jnp.float32) + b1_ref[...]
    h1 = jnp.maximum(h1, 0.0)

    # ---- fused mu | logvar head: one MXU push, 128-aligned halves ----
    ml = jnp.dot(h1.astype(jnp.bfloat16), w2_ref[...],
                 preferred_element_type=jnp.float32) + b2_ref[...]
    mu = ml[:, :opad]                # whole-vreg slice (lane-aligned)
    logvar = ml[:, opad:]            # whole-vreg slice (lane-aligned)

    # ---- reparameterize: z = mu + eps * exp(0.5 * logvar) ----
    z = mu + eps * jnp.exp(0.5 * logvar)

    # ---- decoder: fc3 -> ReLU -> fc4 -> sigmoid ----
    h3 = jnp.dot(z.astype(jnp.bfloat16), w3_ref[...],
                 preferred_element_type=jnp.float32) + b3_ref[...]
    h3 = jnp.maximum(h3, 0.0)
    logits = jnp.dot(h3.astype(jnp.bfloat16), w4_ref[...],
                     preferred_element_type=jnp.float32) + b4_ref[...]
    # sigmoid = 1 / (1 + exp(-x)); approx reciprocal runs on the EUP slot.
    out_ref[...] = pl.reciprocal(1.0 + jnp.exp(-logits),
                                 approx=True).astype(out_ref.dtype)


def mutation_forward(gene_L, gene_D, eps_L, eps_D, params):
    """Equivalent of Mutation.forward: returns (mutated_L, mutated_D)."""
    w1, b1, w2, b2, w3, b3, w4, b4 = params
    B, L = gene_L.shape
    H = w1.shape[1]
    num_out = eps_L.shape[-1]
    opad = w3.shape[0]               # lane-padded latent width
    lpad = w4.shape[1]               # lane-padded output width
    M = 2 * B                        # both genes merged into the batch dim

    x = jnp.concatenate([gene_L, gene_D], axis=0)             # (2B, L)
    eps = jnp.concatenate([eps_L, eps_D], axis=0)             # (2B, num_out)
    eps_pad = jnp.zeros((M, opad), jnp.float32).at[:, :num_out].set(eps)

    flops = 2 * M * (L * H + H * (2 * opad) + opad * H + H * lpad)
    transcendentals = M * (opad + 2 * lpad)
    bytes_accessed = int(
        x.size * 4 + eps_pad.size * 4
        + sum(int(p.size) * p.dtype.itemsize for p in params)
        + M * lpad * 2)

    vmem_spec = pl.BlockSpec(memory_space=pltpu.MemorySpace.VMEM)

    out = pl.pallas_call(
        functools.partial(_vae_kernel, opad=opad),
        out_shape=jax.ShapeDtypeStruct((M, lpad), jnp.bfloat16),
        in_specs=[vmem_spec] * 10,
        out_specs=vmem_spec,
        cost_estimate=pl.CostEstimate(
            flops=flops,
            transcendentals=transcendentals,
            bytes_accessed=bytes_accessed),
    )(x, eps_pad, w1, b1, w2, b2, w3, b3, w4, b4)

    out = out[:, :L].astype(jnp.float32)
    return out[:B], out[B:]


def init_params(key, len_gene, num_hidden, num_out):
    """Deterministic fp32 init matching the PyTorch Linear layers.

    Weights are returned already transposed to [in, out]."""
    ks = jax.random.split(key, 10)

    def linear(kw, kb, fan_in, fan_out):
        bound = 1.0 / jnp.sqrt(fan_in)
        w = jax.random.uniform(kw, (fan_in, fan_out), jnp.float32, -bound, bound)
        b = jax.random.uniform(kb, (1, fan_out), jnp.float32, -bound, bound)
        return w, b

    w1, b1 = linear(ks[0], ks[1], len_gene, num_hidden)    # L_fc1
    w21, b21 = linear(ks[2], ks[3], num_hidden, num_out)   # L_fc21 (mu)
    w22, b22 = linear(ks[4], ks[5], num_hidden, num_out)   # L_fc22 (logvar)
    w3, b3 = linear(ks[6], ks[7], num_out, num_hidden)     # L_fc3
    w4, b4 = linear(ks[8], ks[9], num_hidden, len_gene)    # L_fc4
    return (w1, b1, w21, b21, w22, b22, w3, b3, w4, b4)


def pack_params(raw, len_gene, num_out):
    """Pack the raw fp32 params for the kernel:
       - fuse W21|W22 into one head, each half padded to a 128-lane boundary
         (mu in cols [0,opad), logvar in cols [opad, 2*opad)),
       - pad fc3's input dim to the same opad (zero rows),
       - pad fc4's output dim to a lane multiple (lane-dense stores),
       - cast weights to bf16 (biases stay fp32 for the fp32 epilogue)."""
    w1, b1, w21, b21, w22, b22, w3, b3, w4, b4 = raw
    num_hidden = w1.shape[1]
    opad = _round_up(num_out, LANE)
    lpad = _round_up(len_gene, LANE)

    w2 = jnp.zeros((num_hidden, 2 * opad), jnp.float32)
    w2 = w2.at[:, :num_out].set(w21).at[:, opad:opad + num_out].set(w22)
    b2 = jnp.zeros((1, 2 * opad), jnp.float32)
    b2 = b2.at[:, :num_out].set(b21).at[:, opad:opad + num_out].set(b22)

    w3p = jnp.zeros((opad, num_hidden), jnp.float32).at[:num_out, :].set(w3)

    w4p = jnp.zeros((num_hidden, lpad), jnp.float32).at[:, :len_gene].set(w4)
    b4p = jnp.zeros((1, lpad), jnp.float32).at[:, :len_gene].set(b4)

    return (w1.astype(jnp.bfloat16), b1,
            w2.astype(jnp.bfloat16), b2,
            w3p.astype(jnp.bfloat16), b3,
            w4p.astype(jnp.bfloat16), b4p)


def _reference_forward(x, eps, raw):
    """Pure-JAX reference emulating the kernel's bf16 matmul / fp32 epilogue."""
    w1, b1, w21, b21, w22, b22, w3, b3, w4, b4 = raw
    bf = jnp.bfloat16
    f32 = jnp.float32
    dot = lambda a, b: jnp.dot(a.astype(bf), b.astype(bf),
                               preferred_element_type=f32)
    h1 = jnp.maximum(dot(x, w1) + b1, 0.0)
    mu = dot(h1, w21) + b21
    logvar = dot(h1, w22) + b22
    z = mu + eps * jnp.exp(0.5 * logvar)
    h3 = jnp.maximum(dot(z, w3) + b3, 0.0)
    return jax.nn.sigmoid(dot(h3, w4) + b4)


if __name__ == "__main__":
    # Small, forward-consistent shapes.
    batch = 4
    len_gene = 16    # len_gene_L (== len_gene_D, shared network)
    num_hidden = 32
    num_out = 8

    key = jax.random.PRNGKey(0)
    k_par, k_xl, k_xd, k_el, k_ed = jax.random.split(key, 5)

    raw_params = init_params(k_par, len_gene, num_hidden, num_out)
    params = pack_params(raw_params, len_gene, num_out)

    gene_L = jax.random.normal(k_xl, (batch, len_gene), jnp.float32)
    gene_D = jax.random.normal(k_xd, (batch, len_gene), jnp.float32)
    eps_L = jax.random.normal(k_el, (batch, num_out), jnp.float32)
    eps_D = jax.random.normal(k_ed, (batch, num_out), jnp.float32)

    mutated_L, mutated_D = mutation_forward(gene_L, gene_D, eps_L, eps_D, params)
    jax.block_until_ready((mutated_L, mutated_D))

    ref_L = _reference_forward(gene_L, eps_L, raw_params)
    ref_D = _reference_forward(gene_D, eps_D, raw_params)

    assert mutated_L.shape == (batch, len_gene)
    assert mutated_D.shape == (batch, len_gene)
    assert bool(jnp.all(jnp.isfinite(mutated_L)))
    assert bool(jnp.all(jnp.isfinite(mutated_D)))
    assert bool(jnp.allclose(mutated_L, ref_L, atol=5e-2, rtol=5e-2))
    assert bool(jnp.allclose(mutated_D, ref_D, atol=5e-2, rtol=5e-2))
    print("KERNEL_OK")
</pallas_src>

<mosaic_0001>
module attributes {stable_mosaic.version = 11 : i64} {
  func.func @_vae_kernel(%arg0: memref<8x16xf32, #tpu.memory_space<vmem>>, %arg1: memref<8x128xf32, #tpu.memory_space<vmem>>, %arg2: memref<16x32xbf16, #tpu.memory_space<vmem>>, %arg3: memref<1x32xf32, #tpu.memory_space<vmem>>, %arg4: memref<32x256xbf16, #tpu.memory_space<vmem>>, %arg5: memref<1x256xf32, #tpu.memory_space<vmem>>, %arg6: memref<128x32xbf16, #tpu.memory_space<vmem>>, %arg7: memref<1x32xf32, #tpu.memory_space<vmem>>, %arg8: memref<32x128xbf16, #tpu.memory_space<vmem>>, %arg9: memref<1x128xf32, #tpu.memory_space<vmem>>, %arg10: memref<8x128xbf16, #tpu.memory_space<vmem>>) attributes {dimension_semantics = [], scalar_prefetch = 0 : i64, scratch_operands = 0 : i64, tpu.core_type = #tpu.core_type<tc>} {
    %c0 = arith.constant 0 : index
    %c0_0 = arith.constant 0 : index
    %0 = vector.load %arg0[%c0, %c0_0] : memref<8x16xf32, #tpu.memory_space<vmem>>, vector<8x16xf32>
    %c0_1 = arith.constant 0 : index
    %c0_2 = arith.constant 0 : index
    %1 = vector.load %arg1[%c0_1, %c0_2] : memref<8x128xf32, #tpu.memory_space<vmem>>, vector<8x128xf32>
    %2 = arith.truncf %0 : vector<8x16xf32> to vector<8x16xbf16>
    %c0_3 = arith.constant 0 : index
    %c0_4 = arith.constant 0 : index
    %3 = vector.load %arg2[%c0_3, %c0_4] : memref<16x32xbf16, #tpu.memory_space<vmem>>, vector<16x32xbf16>
    %cst = arith.constant dense<0.000000e+00> : vector<8x32xf32>
    %4 = tpu.matmul %2, %3, %cst {dimension_numbers = #tpu.dot_dimension_numbers<[1], [0], [0], [1], [0, 0, 1, 1], [], []>} : vector<8x16xbf16>, vector<16x32xbf16>, vector<8x32xf32> -> vector<8x32xf32>
    %c0_5 = arith.constant 0 : index
    %c0_6 = arith.constant 0 : index
    %5 = vector.load %arg3[%c0_5, %c0_6] : memref<1x32xf32, #tpu.memory_space<vmem>>, vector<1x32xf32>
    %6 = vector.broadcast %5 : vector<1x32xf32> to vector<8x32xf32>
    %7 = arith.addf %4, %6 : vector<8x32xf32>
    %cst_7 = arith.constant 0.000000e+00 : f32
    %8 = vector.broadcast %cst_7 : f32 to vector<8x32xf32>
    %9 = arith.maximumf %7, %8 : vector<8x32xf32>
    %10 = arith.truncf %9 : vector<8x32xf32> to vector<8x32xbf16>
    %c0_8 = arith.constant 0 : index
    %c0_9 = arith.constant 0 : index
    %11 = vector.load %arg4[%c0_8, %c0_9] : memref<32x256xbf16, #tpu.memory_space<vmem>>, vector<32x256xbf16>
    %cst_10 = arith.constant dense<0.000000e+00> : vector<8x256xf32>
    %12 = tpu.matmul %10, %11, %cst_10 {dimension_numbers = #tpu.dot_dimension_numbers<[1], [0], [0], [1], [0, 0, 1, 1], [], []>} : vector<8x32xbf16>, vector<32x256xbf16>, vector<8x256xf32> -> vector<8x256xf32>
    %c0_11 = arith.constant 0 : index
    %c0_12 = arith.constant 0 : index
    %13 = vector.load %arg5[%c0_11, %c0_12] : memref<1x256xf32, #tpu.memory_space<vmem>>, vector<1x256xf32>
    %14 = vector.broadcast %13 : vector<1x256xf32> to vector<8x256xf32>
    %15 = arith.addf %12, %14 : vector<8x256xf32>
    %16 = vector.extract_strided_slice %15 {offsets = [0, 0], sizes = [8, 128], strides = [1, 1]} : vector<8x256xf32> to vector<8x128xf32>
    %17 = vector.extract_strided_slice %15 {offsets = [0, 128], sizes = [8, 128], strides = [1, 1]} : vector<8x256xf32> to vector<8x128xf32>
    %cst_13 = arith.constant 5.000000e-01 : f32
    %18 = vector.broadcast %cst_13 : f32 to vector<8x128xf32>
    %19 = arith.mulf %18, %17 : vector<8x128xf32>
    %20 = math.exp %19 : vector<8x128xf32>
    %21 = arith.mulf %1, %20 : vector<8x128xf32>
    %22 = arith.addf %16, %21 : vector<8x128xf32>
    %23 = arith.truncf %22 : vector<8x128xf32> to vector<8x128xbf16>
    %c0_14 = arith.constant 0 : index
    %c0_15 = arith.constant 0 : index
    %24 = vector.load %arg6[%c0_14, %c0_15] : memref<128x32xbf16, #tpu.memory_space<vmem>>, vector<128x32xbf16>
    %cst_16 = arith.constant dense<0.000000e+00> : vector<8x32xf32>
    %25 = tpu.matmul %23, %24, %cst_16 {dimension_numbers = #tpu.dot_dimension_numbers<[1], [0], [0], [1], [0, 0, 1, 1], [], []>} : vector<8x128xbf16>, vector<128x32xbf16>, vector<8x32xf32> -> vector<8x32xf32>
    %c0_17 = arith.constant 0 : index
    %c0_18 = arith.constant 0 : index
    %26 = vector.load %arg7[%c0_17, %c0_18] : memref<1x32xf32, #tpu.memory_space<vmem>>, vector<1x32xf32>
    %27 = vector.broadcast %26 : vector<1x32xf32> to vector<8x32xf32>
    %28 = arith.addf %25, %27 : vector<8x32xf32>
    %cst_19 = arith.constant 0.000000e+00 : f32
    %29 = vector.broadcast %cst_19 : f32 to vector<8x32xf32>
    %30 = arith.maximumf %28, %29 : vector<8x32xf32>
    %31 = arith.truncf %30 : vector<8x32xf32> to vector<8x32xbf16>
    %c0_20 = arith.constant 0 : index
    %c0_21 = arith.constant 0 : index
    %32 = vector.load %arg8[%c0_20, %c0_21] : memref<32x128xbf16, #tpu.memory_space<vmem>>, vector<32x128xbf16>
    %cst_22 = arith.constant dense<0.000000e+00> : vector<8x128xf32>
    %33 = tpu.matmul %31, %32, %cst_22 {dimension_numbers = #tpu.dot_dimension_numbers<[1], [0], [0], [1], [0, 0, 1, 1], [], []>} : vector<8x32xbf16>, vector<32x128xbf16>, vector<8x128xf32> -> vector<8x128xf32>
    %c0_23 = arith.constant 0 : index
    %c0_24 = arith.constant 0 : index
    %34 = vector.load %arg9[%c0_23, %c0_24] : memref<1x128xf32, #tpu.memory_space<vmem>>, vector<1x128xf32>
    %35 = vector.broadcast %34 : vector<1x128xf32> to vector<8x128xf32>
    %36 = arith.addf %33, %35 : vector<8x128xf32>
    %cst_25 = arith.constant 0.000000e+00 : f32
    %37 = vector.broadcast %cst_25 : f32 to vector<8x128xf32>
    %38 = arith.subf %37, %36 : vector<8x128xf32>
    %39 = math.exp %38 : vector<8x128xf32>
    %cst_26 = arith.constant 1.000000e+00 : f32
    %40 = vector.broadcast %cst_26 : f32 to vector<8x128xf32>
    %41 = arith.addf %40, %39 : vector<8x128xf32>
    %42 = tpu.reciprocal %41 {approx = true} : vector<8x128xf32> -> vector<8x128xf32>
    %43 = arith.truncf %42 : vector<8x128xf32> to vector<8x128xbf16>
    %c0_27 = arith.constant 0 : index
    %c0_28 = arith.constant 0 : index
    %44 = vector.load %arg10[%c0_27, %c0_28] : memref<8x128xbf16, #tpu.memory_space<vmem>>, vector<8x128xbf16>
    tpu.vector_store %arg10[%c0_27, %c0_28], %43 {strides = array<i32>} : memref<8x128xbf16, #tpu.memory_space<vmem>>, vector<8x128xbf16>,
    return
  }
}

</mosaic_0001>

<bundles_post_ra>
// kernel: tpu_custom_call.1
= control target key start
LH: loop header
LB: loop body
LE: loop exit
PB: predicated region body
PF: predicated region fallthrough
CT: control target
= control target key end

     0   :  { %v506_v1 = vmov 0.0   ;;  %vm507_vm0 = vmmov 0   ;;  %vm55_vm1 = vcmask 130048   ;;  %s636_s0 = inlined_call_operand.vmem [shape: f32[8,16], index: 0, kind: input, shape index: {}]   ;;  %s637_s1 = inlined_call_operand.vmem [shape: f32[8,128], index: 1, kind: input, shape index: {}]   ;;  %s638_s2 = inlined_call_operand.vmem [shape: bf16[16,32], index: 2, kind: input, shape index: {}]   ;;  %s639_s3 = inlined_call_operand.vmem [shape: f32[1,32], index: 3, kind: input, shape index: {}]   ;;  %s640_s4 = inlined_call_operand.vmem [shape: bf16[32,256], index: 4, kind: input, shape index: {}]   ;;  %s641_s5 = inlined_call_operand.vmem [shape: f32[1,256], index: 5, kind: input, shape index: {}]   ;;  %s642_s6 = inlined_call_operand.vmem [shape: bf16[128,32], index: 6, kind: input, shape index: {}]   ;;  %s643_s7 = inlined_call_operand.vmem [shape: f32[1,32], index: 7, kind: input, shape index: {}]   ;;  %s644_s8 = inlined_call_operand.vmem [shape: bf16[32,128], index: 8, kind: input, shape index: {}]   ;;  %s645_s9 = inlined_call_operand.vmem [shape: f32[1,128], index: 9, kind: input, shape index: {}]   ;;  %s646_s10 = inlined_call_operand.hbm [shape: bf16[8,128], index: 10, kind: output, shape index: {}]  }
   0x1   :  { %v461_v0 = vld [vmem:[%s638_s2] sm:$0xff]   ;;  %423 = vmatprep.subr.bf16.mxu1 %v506_v1  ;;  %429 = vmatprep.subr.bf16.mxu0 %v506_v1  ;;  %v462_v4 = vld [vmem:[%s640_s4 + $0x10] ss:$8 sps:$4 sm:$0xff]   ;;  %v464_v5 = vld [vmem:[%s640_s4 + $0x14] ss:$8 sps:$4 sm:$0xff]  }
   0x2   :  { %v37_v2 = vld [vmem:[%s636_s0] sm:$0xff]  ;;  %424 = vmatpush3.bf16.msra.mxu1 %v461_v0  ;;  %425 = vmatprep.mubr.msk.bf16.mxu1 %vm507_vm0, %v506_v1 }
   0x3   :  { %v39_v3 = vpack.c.bf16 %v37_v2, %v37_v2  ;;  %445 = vmatprep.mubr.msk.bf16.mxu0 %vm507_vm0, %v506_v1  ;;  %153 = vmatprep.subr.bf16.mxu1 %v464_v5 }
   0x5   :  { %426 = vmatmul.mubr.msk.bf16.vlgmr.msra.gmra.mxu1 %vm55_vm1, %v39_v3 }
   0x6   :  { %154 = vmatpush1.bf16.msra.mxu1 %v462_v4 }
   0x7   :  { %15 = vsyncpa [#allocation3], 0  ;;  %v467_v6 = vld [vmem:[%s640_s4 + $0x4] ss:$8 sps:$4 sm:$0xff]   ;;  %v465_v7 = vld [vmem:[%s640_s4] ss:$8 sps:$4 sm:$0xff]   ;;  %v107_v26 = vlaneseq }
   0x8   :  { %155 = vmatprep.subr.bf16.mxu1 %v467_v6  ;;  %v508_v8 = vmov 0   ;;  %v468_v9 = vld [vmem:[%s642_s6 + $0x38] sm:$0xff]   ;;  %v388_v10 = vld [vmem:[%s639_s3] ss:$0 sm:$0xff]  ;;  %vm137_vm2 = vcmask 261120   ;;  %v469_v18 = vld [vmem:[%s642_s6 + $0x30] sm:$0xff]  }
   0x9   :  { %173 = vmatprep.mubr.bf16.mxu1 %v508_v8  ;;  %430 = vmatpush3.bf16.msra.mxu0 %v468_v9  ;;  %v470_v19 = vld [vmem:[%s642_s6 + $0x28] sm:$0xff]   ;;  %v471_v20 = vld [vmem:[%s642_s6 + $0x20] sm:$0xff]   ;;  %v472_v21 = vld [vmem:[%s642_s6 + $0x18] sm:$0xff]   ;;  %v108_v27 = vshrl.u32 %v107_v26, 7 }
   0xa   :  { %156 = vmatpush1.bf16.msra.mxu1 %v465_v7  ;;  %431 = vmatprep.subr.bf16.mxu0 %v506_v1  ;;  %v473_v22 = vld [vmem:[%s642_s6 + $0x10] sm:$0xff]   ;;  %v474_v23 = vld [vmem:[%s642_s6 + $0x8] sm:$0xff]   ;;  %v475_v24 = vld [vmem:[%s642_s6] sm:$0xff]  }
   0xb   :  { %449 = vmatprep.subr.bf16.mxu1 %v506_v1  ;;  %v476_v25 = vld [vmem:[%s644_s8 + $0x8] sm:$0xff]   ;;  %v113_v28 = vsub.s32 1, %v108_v27  ;;  %v105_v29 = vld [vmem:[%s641_s5] sm:$0x3]  ;;  %v109_v38 = vsub.s32 0, %v108_v27 }
   0xc   :  { %v38_v40 = vld [vmem:[%s637_s1] sm:$0xff] }
   0xd   :  { %432 = vmatpush3.bf16.msra.mxu0 %v469_v18  ;;  %v114_v30 = vrot.slane %v105_v29, %v113_v28  ;;  %v110_v39 = vrot.slane %v105_v29, %v109_v38  ;;  %v477_v46 = vld [vmem:[%s644_s8] sm:$0xff]  }
   0xe   :  { %433 = vmatprep.subr.bf16.mxu0 %v506_v1  ;;  %v396_v47 = vld [vmem:[%s643_s7] ss:$0 sm:$0xff]  ;;  %s509_s7 = smov [#allocation2]  }
   0xf   :  { %v405_v55 = vld [vmem:[%s645_s9] ss:$0 sm:$0xff]  ;;  %s380_s8 = sshll.u32 %s509_s7, 4  ;;  %s381_s8 = int_to_ptr.vmem [resolvable:$true] %s380_s8 }
  0x10   :  { %s484_s26 = scalar_lea.vmem %s381_s8, 64  ;;  %p489_p1 = scmp.lt.s32.totalorder %s381_s8, %s381_s8 }
  0x11   :  { %434 = vmatpush3.bf16.msra.mxu0 %v470_v19  ;;  %p485_p0 = scmp.ne.s32.totalorder %s381_s8, %s484_s26  ;;  %p490_p2 = scmp.lt.s32.totalorder %s484_s26, %s484_s26 }
  0x12   :  { %435 = vmatprep.subr.bf16.mxu0 %v506_v1 }
  0x13   :  { %p491_p3 = por %p490_p2, %p489_p1 }
  0x15   :  { %436 = vmatpush3.bf16.msra.mxu0 %v471_v20  ;;  %p492_p4 = pnand %p491_p3, %p485_p0 }
  0x16   :  { %437 = vmatprep.subr.bf16.mxu0 %v506_v1 }
  0x19   :  { %438 = vmatpush3.bf16.msra.mxu0 %v472_v21 }
  0x1a   :  { %439 = vmatprep.subr.bf16.mxu0 %v506_v1 }
  0x1d   :  { %440 = vmatpush3.bf16.msra.mxu0 %v473_v22 }
  0x1e   :  { %441 = vmatprep.subr.bf16.mxu0 %v506_v1 }
  0x21   :  { %442 = vmatpush3.bf16.msra.mxu0 %v474_v23 }
  0x22   :  { %443 = vmatprep.subr.bf16.mxu0 %v506_v1 }
  0x25   :  { %444 = vmatpush3.bf16.msra.mxu0 %v475_v24 }
  0xc5   :  { %v93_v11 = vpop.f32.mrf.mxu1 }
  0xc6   :  { %v94_v12 = vadd.f32 %v388_v10, %v93_v11 }
  0xc7   :  { %v427_v13 = vpop.f32.mrf.mxu1 }
  0xc8   :  { %v99_v14 = vmax.f32 %v94_v12, 0.0 }
  0xc9   :  { %v96_v15 = vpop.f32.mrf.mxu1 }
  0xca   :  { %v100_v16 = vpack.c.bf16 %v99_v14, %v99_v14 }
  0xcb   :  { %v428_v17 = vpop.f32.mrf.mxu1 }
  0xcc   :  { %395 = vmatmul.mubr.msk.bf16.vlgmr.msra.gmra.mxu1 %vm137_vm2, %v100_v16 }
  0xcd   :  { %453 = vmatprep.mubr.msk.bf16.mxu1 %vm507_vm0, %v506_v1  ;;  %450 = vmatpush3.bf16.msra.mxu1 %v476_v25 }
  0xce   :  { %451 = vmatprep.subr.bf16.mxu1 %v506_v1 }
  0xd1   :  { %452 = vmatpush3.bf16.msra.mxu1 %v477_v46 }
 0x18c   :  { %v175_v31 = vpop.f32.mrf.mxu1 }
 0x18d   :  { %v176_v42 = vadd.f32 %v175_v31, %v110_v39 }
 0x18e   :  { %v177_v32 = vpop.f32.mrf.mxu1 }
 0x18f   :  { %v178_v33 = vadd.f32 %v177_v32, %v114_v30 }
 0x190   :  { %v179_v34 = vpop.f32.mrf.mxu1 }
 0x191   :  { %v182_v35 = vmul.f32 0.5, %v178_v33 }
 0x192   :  { %v180_v36 = vpop.f32.mrf.mxu1 }
 0x193   :  { %v183_v37 = vmul.f32 1.442695, %v182_v35 }
 0x195   :  { %478 = vpow2.f32 %v183_v37 }
 0x1a2   :  { %v479_v41 = vpop.eup %478 }
 0x1a3   :  { %v185_v43 = vmul.f32 %v479_v41, %v38_v40 }
 0x1a5   :  { %v186_v44 = vadd.f32 %v185_v43, %v176_v42 }
 0x1a7   :  { %v187_v45 = vpack.c.bf16 %v186_v44, %v186_v44 }
 0x1a9   :  { %446 = vmatmul.mubr.bf16.vlgmr.msra.gmra.mxu0 %v187_v45 }
 0x269   :  { %v293_v48 = vpop.f32.mrf.mxu0 }
 0x26a   :  { %v294_v49 = vadd.f32 %v396_v47, %v293_v48 }
 0x26b   :  { %v447_v50 = vpop.f32.mrf.mxu0 }
 0x26c   :  { %v299_v51 = vmax.f32 %v294_v49, 0.0 }
 0x26d   :  { %v296_v52 = vpop.f32.mrf.mxu0 }
 0x26e   :  { %v300_v53 = vpack.c.bf16 %v299_v51, %v299_v51 }
 0x26f   :  { %v448_v54 = vpop.f32.mrf.mxu0 }
 0x270   :  { %454 = vmatmul.mubr.msk.bf16.vlgmr.msra.gmra.mxu1 %vm137_vm2, %v300_v53 }
 0x330   :  { %v361_v56 = vpop.f32.mrf.mxu1 }
 0x331   :  { %v362_v57 = vadd.f32 %v405_v55, %v361_v56 }
 0x332   :  { %v455_v58 = vpop.f32.mrf.mxu1 }
 0x333   :  { %v367_v59 = vsub.f32 0.0, %v362_v57 }
 0x334   :  { %v364_v60 = vpop.f32.mrf.mxu1 }
 0x335   :  { %v368_v61 = vmul.f32 1.442695, %v367_v59 }
 0x336   :  { %v456_v62 = vpop.f32.mrf.mxu1 }
 0x337   :  { %480 = vpow2.f32 %v368_v61 }
 0x344   :  { %v481_v63 = vpop.eup %480 }
 0x345   :  { %v370_v0 = vadd.f32 1.0, %v481_v63 }
 0x347   :  { %482 = vrcp.f32 %v370_v0 }
 0x354   :  { %v483_v1 = vpop.eup %482 }
 0x355   :  { %v372_v2 = vpack.c.bf16 %v483_v1, %v483_v1 }
 0x357   :  { %373 = vst [vmem:[#allocation2] sm:$0xf] %v372_v2 }
 0x358   :  { %495 = shalt.err (!%p492_p4)
}
 0x359   :  { %383 = dma.vmem_to_hbm [thread:$0]  %s381_s8, 64, %s646_s10, [#allocation3]  }
 0x35a   :  { %504 = dma.done.wait [#allocation3], 64  }
 0x35b   :  { %505 = vsyncadd [#allocation3], 4294967232 }
 0x35c   :  { %387 = vsyncpa [#allocation3], 1 }

</bundles_post_ra>
